<compile_context>
chip_gen: v7x
topology: tpu7x:2x2x1
jax: 0.10.0
libtpu: 0.0.40
codegen_flags: <defaults>
</compile_context>

<pallas_src>
from functools import lru_cache, partial

import jax
import jax.numpy as jnp
from jax import lax
from jax.experimental import pallas as pl
from jax.experimental.pallas import tpu as pltpu


_NEG_INF = -1e30        # finite "-inf": exp() underflows to exactly 0, no NaNs


# ----------------------------------------------------------------------------
# Hardware-aware knobs
# ----------------------------------------------------------------------------
def get_rank(ratio, a, b):
    return int(a * b * ratio / (a + b))


def _round_up(x, m):
    return ((x + m - 1) // m) * m


@lru_cache(maxsize=1)
def _vmem_limit_bytes():
    """Generation-aware scoped-VMEM limit: ~96 MiB on v5e/v6e (128 MiB VMEM),
    ~48 MiB on v7x (64 MiB VMEM), conservative 32 MiB fallback."""
    try:
        cap = int(pltpu.get_tpu_info().vmem_capacity_bytes)
        return max(32 * 1024 * 1024, (cap * 3) // 4)
    except Exception:
        return 32 * 1024 * 1024


@lru_cache(maxsize=1)
def _device_kind():
    try:
        return jax.devices()[0].device_kind.lower()
    except Exception:
        return ""


def _proj_tile_n():
    # Bigger row tiles on v5e/v6e (128 MiB VMEM), smaller on v7x (64 MiB).
    return 1024 if _vmem_limit_bytes() >= 80 * 1024 * 1024 else 256


def _attn_tiles(S):
    if S <= 128:
        return S, S
    # TODO(synk): ragged (non-multiple-of-128) sequence lengths not handled.
    assert S % 128 == 0
    tq = 128
    # 256-wide KV tiles better fill the 2x256x256 MXUs on v6e/v7x; keep 128 on v5e.
    tk = 256 if ("v5" not in _device_kind() and S % 256 == 0) else 128
    return tq, tk


def _pick_groups(num_kv_heads, n_rep, head_dim):
    """Largest split G of the KV heads s.t. the q and k lane blocks stay
    lane-dense (multiple of 128) or cover the full array dim."""
    best = 1
    for g in range(1, num_kv_heads + 1):
        if num_kv_heads % g:
            continue
        kw = (num_kv_heads // g) * head_dim
        qw = (num_kv_heads // g) * n_rep * head_dim
        if g == 1 or (kw % 128 == 0 and qw % 128 == 0):
            best = g
    return best


# ----------------------------------------------------------------------------
# Weight preparation: transpose nn.Linear weights to (in, rank) / (rank, out),
# zero-pad the rank to a multiple of 128 (lane-dense MXU intermediate) and
# store them in bf16 (native MXU dtype, half the HBM/VMEM footprint).
# ----------------------------------------------------------------------------
def _prepare_pair(w_v, w_u, lane=128, dtype=jnp.bfloat16):
    """w_v: (rank, in), w_u: (out, rank) -> (in, rank_p) bf16, (rank_p, out) bf16."""
    wv_t = jnp.asarray(w_v).T          # (in, rank)
    wu_t = jnp.asarray(w_u).T          # (rank, out)
    rank = wv_t.shape[1]
    rank_p = _round_up(rank, lane)
    if rank_p != rank:
        wv_t = jnp.pad(wv_t, ((0, 0), (0, rank_p - rank)))
        wu_t = jnp.pad(wu_t, ((0, rank_p - rank), (0, 0)))
    return wv_t.astype(dtype), wu_t.astype(dtype)


def prepare_params(params):
    prepared = {}
    for name in ("q", "k", "v", "o"):
        wv, wu = _prepare_pair(params[f"{name}_v"], params[f"{name}_u"])
        prepared[f"{name}_v"] = wv
        prepared[f"{name}_u"] = wu
    return prepared


# ----------------------------------------------------------------------------
# RoPE helper.  sin_signed has its first half pre-negated, so
# rotate_half(x) * sin == roll(x, D//2) * sin_signed  (matches jnp.roll /
# concat([x2, x1]) convention; the pltpu.roll path is taken for D % 128 == 0).
# ----------------------------------------------------------------------------
def _apply_rope(x, cos, sin_signed):
    d = x.shape[-1]
    if d % 128 == 0:
        x_rot = pltpu.roll(x, shift=d // 2, axis=-1)   # XLU slot, ~free
    else:
        x_rot = jnp.concatenate([x[..., d // 2:], x[..., : d // 2]], axis=-1)
    return x * cos + x_rot * sin_signed


# ----------------------------------------------------------------------------
# Kernel 1: fused q/k/v SVD projections + RoPE(+scale for q) epilogue,
# tiled over the B*S rows.  bf16 MXU, f32 accumulation.
# ----------------------------------------------------------------------------
def _qkv_proj_kernel(x_ref, cos_ref, sin_ref,
                     wq_v, wq_u, wk_v, wk_u, wv_v, wv_u,
                     q_ref, k_ref, v_ref, *, head_dim, scaling):
    x = x_ref[...].astype(jnp.bfloat16)
    cos = cos_ref[...]
    sin = sin_ref[...]
    D = head_dim

    def proj(wv, wu):
        tmp = jnp.dot(x, wv[...], preferred_element_type=jnp.float32)
        return jnp.dot(tmp.astype(jnp.bfloat16), wu[...],
                       preferred_element_type=jnp.float32)

    q = proj(wq_v, wq_u)                                    # (tn, H*D) f32
    n_q = q.shape[-1] // D
    q_ref[...] = jnp.concatenate(
        [_apply_rope(q[:, h * D:(h + 1) * D], cos, sin) * scaling
         for h in range(n_q)], axis=-1).astype(q_ref.dtype)

    k = proj(wk_v, wk_u)                                    # (tn, Hkv*D) f32
    n_k = k.shape[-1] // D
    k_ref[...] = jnp.concatenate(
        [_apply_rope(k[:, h * D:(h + 1) * D], cos, sin)
         for h in range(n_k)], axis=-1).astype(k_ref.dtype)

    v_ref[...] = proj(wv_v, wv_u).astype(v_ref.dtype)


def qkv_proj_rope(x, cos, sin_signed, p, *, head_dim, scaling):
    """x: (N, hidden); cos/sin_signed: (N, D).  Returns rotated+scaled q,
    rotated k and plain v, each (N, heads*D)."""
    N, hidden = x.shape
    tile_n = _proj_tile_n()
    tn = N if N <= tile_n else tile_n
    weights = (p["q_v"], p["q_u"], p["k_v"], p["k_u"], p["v_v"], p["v_u"])
    dq, dk, dv = p["q_u"].shape[1], p["k_u"].shape[1], p["v_u"].shape[1]

    w_elems = sum(w.shape[0] * w.shape[1] for w in weights)
    cost = pl.CostEstimate(
        flops=2 * N * w_elems, transcendentals=0,
        bytes_accessed=4 * N * (hidden + dq + dk + dv) + 2 * w_elems)

    def row(d):
        return pl.BlockSpec((tn, d), lambda i: (i, 0))

    # TODO(synk): at production sizes on v7x (hidden=4096, rank_p~2048) tile the
    # rank/out dims of the weights with an extra "arbitrary" grid axis and use
    # pipeline_mode=pl.Buffered(1) rather than keeping all six resident.
    def full(w):
        return pl.BlockSpec(w.shape, lambda i: (0, 0))

    return pl.pallas_call(
        partial(_qkv_proj_kernel, head_dim=head_dim, scaling=scaling),
        out_shape=(jax.ShapeDtypeStruct((N, dq), x.dtype),
                   jax.ShapeDtypeStruct((N, dk), x.dtype),
                   jax.ShapeDtypeStruct((N, dv), x.dtype)),
        grid=(pl.cdiv(N, tn),),
        in_specs=[row(hidden), row(head_dim), row(head_dim)]
                 + [full(w) for w in weights],
        out_specs=(row(dq), row(dk), row(dv)),
        compiler_params=pltpu.CompilerParams(
            dimension_semantics=("parallel",),
            vmem_limit_bytes=_vmem_limit_bytes()),
        cost_estimate=cost,
    )(x, cos, sin_signed, *weights)


# ----------------------------------------------------------------------------
# Kernel 2: single SVD projection (output projection), row-tiled, bf16 MXU.
# ----------------------------------------------------------------------------
def _svd_proj_kernel(x_ref, wv, wu, o_ref):
    tmp = jnp.dot(x_ref[...].astype(jnp.bfloat16), wv[...],
                  preferred_element_type=jnp.float32)
    o_ref[...] = jnp.dot(tmp.astype(jnp.bfloat16), wu[...],
                         preferred_element_type=jnp.float32).astype(o_ref.dtype)


def svd_proj(x, w_v, w_u):
    N, in_dim = x.shape
    rank_p, out_dim = w_u.shape
    tile_n = _proj_tile_n()
    tn = N if N <= tile_n else tile_n
    cost = pl.CostEstimate(
        flops=2 * N * (in_dim * rank_p + rank_p * out_dim), transcendentals=0,
        bytes_accessed=4 * N * (in_dim + out_dim)
                       + 2 * (in_dim * rank_p + rank_p * out_dim))
    return pl.pallas_call(
        _svd_proj_kernel,
        out_shape=jax.ShapeDtypeStruct((N, out_dim), x.dtype),
        grid=(pl.cdiv(N, tn),),
        in_specs=[pl.BlockSpec((tn, in_dim), lambda i: (i, 0)),
                  pl.BlockSpec(w_v.shape, lambda i: (0, 0)),
                  pl.BlockSpec(w_u.shape, lambda i: (0, 0))],
        out_specs=pl.BlockSpec((tn, out_dim), lambda i: (i, 0)),
        compiler_params=pltpu.CompilerParams(
            dimension_semantics=("parallel",),
            vmem_limit_bytes=_vmem_limit_bytes()),
        cost_estimate=cost,
    )(x, w_v, w_u)


# ----------------------------------------------------------------------------
# Kernel 3: flash attention, grid (B, KV-group, Q-blocks, KV-blocks) in the
# natural (B, S, heads*D) layout (no transposes).  GQA-packed: all query heads
# of a KV group share one K/V tile per grid step.
# ----------------------------------------------------------------------------
def _flash_attn_kernel(q_ref, k_ref, v_ref, o_ref, lse_ref,
                       q_sc, m_sc, l_sc, acc_sc,
                       *, tq, tk, kv_per_g, n_rep, head_dim):
    qi = pl.program_id(2)
    ki = pl.program_id(3)
    D = head_dim
    heads = kv_per_g * n_rep

    @pl.when(ki == 0)
    def _():
        m_sc[...] = jnp.full(m_sc.shape, _NEG_INF, jnp.float32)
        l_sc[...] = jnp.zeros(l_sc.shape, jnp.float32)
        acc_sc[...] = jnp.zeros(acc_sc.shape, jnp.float32)
        # q already has RoPE + softmax scale folded in by the projection
        # kernel; cache a bf16 copy once per q block (hoisted out of KV loop).
        for m in range(heads):
            q_sc[m] = q_ref[0, :, m * D:(m + 1) * D].astype(jnp.bfloat16)

    q_first = qi * tq
    q_last = q_first + tq - 1
    k_first = ki * tk
    k_last = k_first + tk - 1

    def tile_body(apply_mask):
        if apply_mask:
            row = q_first + lax.broadcasted_iota(jnp.int32, (tq, tk), 0)
            col = k_first + lax.broadcasted_iota(jnp.int32, (tq, tk), 1)
            visible = col <= row
        for j in range(kv_per_g):
            k_j = k_ref[0, :, j * D:(j + 1) * D].astype(jnp.bfloat16)
            v_j = v_ref[0, :, j * D:(j + 1) * D].astype(jnp.bfloat16)
            for r in range(n_rep):
                m = j * n_rep + r
                s = lax.dot_general(q_sc[m], k_j, (((1,), (1,)), ((), ())),
                                    preferred_element_type=jnp.float32)
                if apply_mask:
                    s = jnp.where(visible, s, _NEG_INF)
                m_prev = m_sc[m]
                m_new = jnp.maximum(m_prev, jnp.max(s, axis=-1, keepdims=True))
                alpha = jnp.exp(m_prev - m_new)
                p = jnp.exp(s - m_new)
                l_sc[m] = alpha * l_sc[m] + jnp.sum(p, axis=-1, keepdims=True)
                acc_sc[m] = alpha * acc_sc[m] + lax.dot_general(
                    p.astype(jnp.bfloat16), v_j, (((1,), (0,)), ((), ())),
                    preferred_element_type=jnp.float32)
                m_sc[m] = m_new

    # Fully-visible tiles (entirely below the causal diagonal): no mask work.
    @pl.when(k_last <= q_first)
    def _():
        tile_body(False)

    # Diagonal-straddling tiles: build the causal mask in-kernel via iota.
    @pl.when((k_first <= q_last) & (k_last > q_first))
    def _():
        tile_body(True)

    # Fully-masked tiles are skipped; their K/V DMA is elided by the clamped
    # index_map in the wrapper.

    @pl.when(ki == pl.num_programs(3) - 1)
    def _():
        pieces = []
        for m in range(heads):
            pieces.append(acc_sc[m] / l_sc[m])     # exact divide, once/block
            # TODO(synk): LSE stored with a trailing dim of 1 (masked stores);
            # a lane-dense (B,H,S) layout needs a sublane->lane relayout here.
            lse_ref[0, m] = m_sc[m] + jnp.log(l_sc[m])
        o_ref[0] = jnp.concatenate(pieces, axis=-1).astype(o_ref.dtype)


def flash_attention(q3, k3, v3, *, num_heads, num_kv_heads, head_dim, tq, tk):
    B, S, _ = q3.shape
    n_rep = num_heads // num_kv_heads
    G = _pick_groups(num_kv_heads, n_rep, head_dim)
    kv_per_g = num_kv_heads // G
    heads_per_g = kv_per_g * n_rep
    qw = heads_per_g * head_dim
    kw = kv_per_g * head_dim
    nq, nk = S // tq, S // tk

    q_idx = lambda b, g, qi, ki: (b, qi, g)
    # Clamp ki so fully-masked (upper-triangle) KV tiles repeat the previous
    # block index and their DMA is elided.
    kv_idx = lambda b, g, qi, ki: (b, jnp.minimum(ki, (qi * tq + tq - 1) // tk), g)
    lse_idx = lambda b, g, qi, ki: (b, g, qi, 0)

    cost = pl.CostEstimate(
        flops=2 * B * num_heads * S * S * head_dim,
        transcendentals=B * num_heads * S * S // 2,
        bytes_accessed=4 * B * S * (2 * num_heads + 2 * num_kv_heads) * head_dim)

    kernel = partial(_flash_attn_kernel, tq=tq, tk=tk, kv_per_g=kv_per_g,
                     n_rep=n_rep, head_dim=head_dim)
    return pl.pallas_call(
        kernel,
        out_shape=(jax.ShapeDtypeStruct((B, S, num_heads * head_dim), q3.dtype),
                   jax.ShapeDtypeStruct((B, num_heads, S, 1), jnp.float32)),
        grid=(B, G, nq, nk),
        in_specs=[pl.BlockSpec((1, tq, qw), q_idx),
                  pl.BlockSpec((1, tk, kw), kv_idx),
                  pl.BlockSpec((1, tk, kw), kv_idx)],
        out_specs=(pl.BlockSpec((1, tq, qw), q_idx),
                   pl.BlockSpec((1, heads_per_g, tq, 1), lse_idx)),
        scratch_shapes=[pltpu.VMEM((heads_per_g, tq, head_dim), jnp.bfloat16),
                        pltpu.VMEM((heads_per_g, tq, 1), jnp.float32),
                        pltpu.VMEM((heads_per_g, tq, 1), jnp.float32),
                        pltpu.VMEM((heads_per_g, tq, head_dim), jnp.float32)],
        compiler_params=pltpu.CompilerParams(
            dimension_semantics=("parallel", "parallel", "parallel",
                                 "arbitrary"),
            vmem_limit_bytes=_vmem_limit_bytes()),
        cost_estimate=cost,
    )(q3, k3, v3)


# ----------------------------------------------------------------------------
# Kernel 4: attention-weights reconstruction from the LSE (output_attentions).
# Fully parallel; fully-masked tiles write zeros without touching K.
# ----------------------------------------------------------------------------
def _attn_weights_kernel(q_ref, k_ref, lse_ref, w_ref,
                         *, tq, tk, kv_per_g, n_rep, head_dim):
    qi = pl.program_id(2)
    ki = pl.program_id(3)
    D = head_dim
    q_first = qi * tq
    q_last = q_first + tq - 1
    k_first = ki * tk

    @pl.when(k_first > q_last)                    # fully masked -> zeros
    def _():
        w_ref[...] = jnp.zeros(w_ref.shape, w_ref.dtype)

    @pl.when(k_first <= q_last)
    def _():
        row = q_first + lax.broadcasted_iota(jnp.int32, (tq, tk), 0)
        col = k_first + lax.broadcasted_iota(jnp.int32, (tq, tk), 1)
        visible = col <= row
        for j in range(kv_per_g):
            k_j = k_ref[0, :, j * D:(j + 1) * D].astype(jnp.bfloat16)
            for r in range(n_rep):
                m = j * n_rep + r
                q_m = q_ref[0, :, m * D:(m + 1) * D].astype(jnp.bfloat16)
                s = lax.dot_general(q_m, k_j, (((1,), (1,)), ((), ())),
                                    preferred_element_type=jnp.float32)
                s = jnp.where(visible, s, _NEG_INF)
                w_ref[0, m] = jnp.exp(s - lse_ref[0, m]).astype(w_ref.dtype)


def attention_weights(q3, k3, lse, *, num_heads, num_kv_heads, head_dim, tq, tk):
    B, S, _ = q3.shape
    n_rep = num_heads // num_kv_heads
    G = _pick_groups(num_kv_heads, n_rep, head_dim)
    kv_per_g = num_kv_heads // G
    heads_per_g = kv_per_g * n_rep
    qw = heads_per_g * head_dim
    kw = kv_per_g * head_dim
    nq, nk = S // tq, S // tk

    q_idx = lambda b, g, qi, ki: (b, qi, g)
    kv_idx = lambda b, g, qi, ki: (b, jnp.minimum(ki, (qi * tq + tq - 1) // tk), g)
    lse_idx = lambda b, g, qi, ki: (b, g, qi, 0)
    w_idx = lambda b, g, qi, ki: (b, g, qi, ki)

    cost = pl.CostEstimate(
        flops=2 * B * num_heads * S * S * head_dim,
        transcendentals=B * num_heads * S * S,
        bytes_accessed=4 * B * num_heads * S * S)
    kernel = partial(_attn_weights_kernel, tq=tq, tk=tk, kv_per_g=kv_per_g,
                     n_rep=n_rep, head_dim=head_dim)
    return pl.pallas_call(
        kernel,
        out_shape=jax.ShapeDtypeStruct((B, num_heads, S, S), q3.dtype),
        grid=(B, G, nq, nk),
        in_specs=[pl.BlockSpec((1, tq, qw), q_idx),
                  pl.BlockSpec((1, tk, kw), kv_idx),
                  pl.BlockSpec((1, heads_per_g, tq, 1), lse_idx)],
        out_specs=pl.BlockSpec((1, heads_per_g, tq, tk), w_idx),
        compiler_params=pltpu.CompilerParams(
            dimension_semantics=("parallel",) * 4,
            vmem_limit_bytes=_vmem_limit_bytes()),
        cost_estimate=cost,
    )(q3, k3, lse)


# ----------------------------------------------------------------------------
# Module-level forward (glue is reshapes only; no HBM transposes).
# ----------------------------------------------------------------------------
def svd_llama_attention_forward(hidden_states, cos, sin, prepared_params, *,
                                num_heads, num_kv_heads, head_dim,
                                output_attentions=True):
    B, S, Hd = hidden_states.shape
    N = B * S
    scaling = head_dim ** (-0.5)

    # Pre-signed sin: rotate_half(x)*sin == roll(x, D/2)*sin_signed.
    half = head_dim // 2
    sign = jnp.concatenate([-jnp.ones((half,), cos.dtype),
                            jnp.ones((head_dim - half,), cos.dtype)])
    cos2d = cos.reshape(N, head_dim)
    sin2d = (sin * sign).reshape(N, head_dim)

    x2d = hidden_states.reshape(N, Hd)
    q2d, k2d, v2d = qkv_proj_rope(x2d, cos2d, sin2d, prepared_params,
                                  head_dim=head_dim, scaling=scaling)

    # Free reshapes into the (B, S, heads*D) layout the attention kernel reads.
    q3 = q2d.reshape(B, S, num_heads * head_dim)
    k3 = k2d.reshape(B, S, num_kv_heads * head_dim)
    v3 = v2d.reshape(B, S, num_kv_heads * head_dim)

    tq, tk = _attn_tiles(S)
    attn_out3, lse = flash_attention(q3, k3, v3, num_heads=num_heads,
                                     num_kv_heads=num_kv_heads,
                                     head_dim=head_dim, tq=tq, tk=tk)

    attn_weights = None
    if output_attentions:
        attn_weights = attention_weights(q3, k3, lse, num_heads=num_heads,
                                         num_kv_heads=num_kv_heads,
                                         head_dim=head_dim, tq=tq, tk=tk)

    ao2d = attn_out3.reshape(N, num_heads * head_dim)       # free reshape
    out = svd_proj(ao2d, prepared_params["o_v"],
                   prepared_params["o_u"]).reshape(B, S, Hd)
    return out, attn_weights


# ----------------------------------------------------------------------------
# Pure-JAX fp32 reference (eager path of the PyTorch module).
# ----------------------------------------------------------------------------
def _ref_forward(hidden_states, cos, sin, attention_mask, params, *,
                 num_heads, num_kv_heads, head_dim):
    B, S, Hd = hidden_states.shape
    scaling = head_dim ** (-0.5)

    def lin(x, w):
        return x @ w.T

    q = lin(lin(hidden_states, params["q_v"]), params["q_u"])
    k = lin(lin(hidden_states, params["k_v"]), params["k_u"])
    v = lin(lin(hidden_states, params["v_v"]), params["v_u"])

    q = q.reshape(B, S, num_heads, head_dim).transpose(0, 2, 1, 3)
    k = k.reshape(B, S, num_kv_heads, head_dim).transpose(0, 2, 1, 3)
    v = v.reshape(B, S, num_kv_heads, head_dim).transpose(0, 2, 1, 3)

    def rotate_half(x):
        d = x.shape[-1]
        return jnp.concatenate([-x[..., d // 2:], x[..., : d // 2]], axis=-1)

    c = cos[:, None, :, :]
    s = sin[:, None, :, :]
    q = q * c + rotate_half(q) * s
    k = k * c + rotate_half(k) * s

    n_rep = num_heads // num_kv_heads
    k = jnp.repeat(k, n_rep, axis=1)
    v = jnp.repeat(v, n_rep, axis=1)

    scores = jnp.einsum("bhqd,bhkd->bhqk", q, k) * scaling + attention_mask
    w = jax.nn.softmax(scores.astype(jnp.float32), axis=-1)
    o = jnp.einsum("bhqk,bhkd->bhqd", w, v)
    o = o.transpose(0, 2, 1, 3).reshape(B, S, num_heads * head_dim)
    o = lin(lin(o, params["o_v"]), params["o_u"])
    return o, w


# ----------------------------------------------------------------------------
# main
# ----------------------------------------------------------------------------
if __name__ == "__main__":
    batch = 2
    seq = 8
    hidden_size = 32
    num_heads = 4
    num_kv_heads = 2
    head_dim = hidden_size // num_heads           # 8
    ratio = 1.0
    rope_theta = 10000.0

    qo_rank = get_rank(ratio, hidden_size, num_heads * head_dim)      # 16
    kv_rank = get_rank(ratio, hidden_size, num_kv_heads * head_dim)   # 10

    key = jax.random.PRNGKey(0)
    ks = jax.random.split(key, 10)
    init = lambda k, shape: (0.02 * jax.random.normal(k, shape)).astype(jnp.float32)

    # Parameters in PyTorch nn.Linear convention: W (out_features, in_features).
    params = {
        "q_v": init(ks[0], (qo_rank, hidden_size)),
        "q_u": init(ks[1], (num_heads * head_dim, qo_rank)),
        "k_v": init(ks[2], (kv_rank, hidden_size)),
        "k_u": init(ks[3], (num_kv_heads * head_dim, kv_rank)),
        "v_v": init(ks[4], (kv_rank, hidden_size)),
        "v_u": init(ks[5], (num_kv_heads * head_dim, kv_rank)),
        "o_v": init(ks[6], (qo_rank, num_heads * head_dim)),
        "o_u": init(ks[7], (hidden_size, qo_rank)),
    }
    prepared = prepare_params(params)   # transpose + rank pad + bf16, one-time

    hidden_states = jax.random.normal(ks[8], (batch, seq, hidden_size),
                                      dtype=jnp.float32)

    # Rotary position embeddings (Llama-style), shape (B, S, head_dim).
    inv_freq = 1.0 / (rope_theta ** (jnp.arange(0, head_dim, 2,
                                                dtype=jnp.float32) / head_dim))
    pos = jnp.arange(seq, dtype=jnp.float32)
    freqs = pos[:, None] * inv_freq[None, :]                 # (S, D/2)
    emb = jnp.concatenate([freqs, freqs], axis=-1)           # (S, D)
    cos = jnp.broadcast_to(jnp.cos(emb)[None], (batch, seq, head_dim))
    sin = jnp.broadcast_to(jnp.sin(emb)[None], (batch, seq, head_dim))

    # Additive causal mask (reference only; the kernel builds it via iota).
    neg = jnp.finfo(jnp.float32).min
    causal = jnp.where(jnp.tril(jnp.ones((seq, seq), dtype=bool)), 0.0, neg)
    attention_mask = jnp.broadcast_to(causal[None, None],
                                      (batch, 1, seq, seq)).astype(jnp.float32)

    out, attn_w = svd_llama_attention_forward(
        hidden_states, cos, sin, prepared,
        num_heads=num_heads, num_kv_heads=num_kv_heads, head_dim=head_dim,
        output_attentions=True)
    out = jax.block_until_ready(out)
    attn_w = jax.block_until_ready(attn_w)

    ref_out, ref_w = _ref_forward(
        hidden_states, cos, sin, attention_mask, params,
        num_heads=num_heads, num_kv_heads=num_kv_heads, head_dim=head_dim)

    assert out.shape == (batch, seq, hidden_size)
    assert attn_w.shape == (batch, num_heads, seq, seq)
    # bf16 MXU path -> slightly relaxed tolerances vs the fp32 reference.
    assert jnp.allclose(out, ref_out, atol=1e-3, rtol=1e-2), \
        float(jnp.max(jnp.abs(out - ref_out)))
    assert jnp.allclose(attn_w, ref_w, atol=1e-3, rtol=1e-2), \
        float(jnp.max(jnp.abs(attn_w - ref_w)))

    # TODO(synk): past_key_value / KV-cache update, arbitrary (non-causal /
    # padding) attention_mask and training-mode dropout are not implemented in
    # this synthetic inference setting.
    print("KERNEL_OK")
</pallas_src>

<mosaic_0001>
module attributes {stable_mosaic.version = 11 : i64} {
  func.func @_qkv_proj_kernel(%arg0: i32, %arg1: memref<16x32xf32, #tpu.memory_space<vmem>>, %arg2: memref<16x8xf32, #tpu.memory_space<vmem>>, %arg3: memref<16x8xf32, #tpu.memory_space<vmem>>, %arg4: memref<32x128xbf16, #tpu.memory_space<vmem>>, %arg5: memref<128x32xbf16, #tpu.memory_space<vmem>>, %arg6: memref<32x128xbf16, #tpu.memory_space<vmem>>, %arg7: memref<128x16xbf16, #tpu.memory_space<vmem>>, %arg8: memref<32x128xbf16, #tpu.memory_space<vmem>>, %arg9: memref<128x16xbf16, #tpu.memory_space<vmem>>, %arg10: memref<16x32xf32, #tpu.memory_space<vmem>>, %arg11: memref<16x16xf32, #tpu.memory_space<vmem>>, %arg12: memref<16x16xf32, #tpu.memory_space<vmem>>) attributes {dimension_semantics = [#tpu.dimension_semantics<parallel>], iteration_bounds = array<i64: 1>, scalar_prefetch = 0 : i64, scratch_operands = 0 : i64, tpu.core_type = #tpu.core_type<tc>, window_params = [{transform_indices = @transform_0, window_bounds = array<i64: 16, 32>}, {transform_indices = @transform_1, window_bounds = array<i64: 16, 8>}, {transform_indices = @transform_2, window_bounds = array<i64: 16, 8>}, {pipeline_mode = #tpu.pipeline_mode<synchronous>, transform_indices = @transform_3, window_bounds = array<i64: 32, 128>}, {pipeline_mode = #tpu.pipeline_mode<synchronous>, transform_indices = @transform_4, window_bounds = array<i64: 128, 32>}, {pipeline_mode = #tpu.pipeline_mode<synchronous>, transform_indices = @transform_5, window_bounds = array<i64: 32, 128>}, {pipeline_mode = #tpu.pipeline_mode<synchronous>, transform_indices = @transform_6, window_bounds = array<i64: 128, 16>}, {pipeline_mode = #tpu.pipeline_mode<synchronous>, transform_indices = @transform_7, window_bounds = array<i64: 32, 128>}, {pipeline_mode = #tpu.pipeline_mode<synchronous>, transform_indices = @transform_8, window_bounds = array<i64: 128, 16>}, {transform_indices = @transform_9, window_bounds = array<i64: 16, 32>}, {transform_indices = @transform_10, window_bounds = array<i64: 16, 16>}, {transform_indices = @transform_11, window_bounds = array<i64: 16, 16>}]} {
    %c0 = arith.constant 0 : index
    %c0_0 = arith.constant 0 : index
    %0 = vector.load %arg1[%c0, %c0_0] : memref<16x32xf32, #tpu.memory_space<vmem>>, vector<16x32xf32>
    %1 = arith.truncf %0 : vector<16x32xf32> to vector<16x32xbf16>
    %c0_1 = arith.constant 0 : index
    %c0_2 = arith.constant 0 : index
    %2 = vector.load %arg2[%c0_1, %c0_2] : memref<16x8xf32, #tpu.memory_space<vmem>>, vector<16x8xf32>
    %c0_3 = arith.constant 0 : index
    %c0_4 = arith.constant 0 : index
    %3 = vector.load %arg3[%c0_3, %c0_4] : memref<16x8xf32, #tpu.memory_space<vmem>>, vector<16x8xf32>
    %c0_5 = arith.constant 0 : index
    %c0_6 = arith.constant 0 : index
    %4 = vector.load %arg4[%c0_5, %c0_6] : memref<32x128xbf16, #tpu.memory_space<vmem>>, vector<32x128xbf16>
    %cst = arith.constant dense<0.000000e+00> : vector<16x128xf32>
    %5 = tpu.matmul %1, %4, %cst {dimension_numbers = #tpu.dot_dimension_numbers<[1], [0], [0], [1], [0, 0, 1, 1], [], []>} : vector<16x32xbf16>, vector<32x128xbf16>, vector<16x128xf32> -> vector<16x128xf32>
    %6 = arith.truncf %5 : vector<16x128xf32> to vector<16x128xbf16>
    %c0_7 = arith.constant 0 : index
    %c0_8 = arith.constant 0 : index
    %7 = vector.load %arg5[%c0_7, %c0_8] : memref<128x32xbf16, #tpu.memory_space<vmem>>, vector<128x32xbf16>
    %cst_9 = arith.constant dense<0.000000e+00> : vector<16x32xf32>
    %8 = tpu.matmul %6, %7, %cst_9 {dimension_numbers = #tpu.dot_dimension_numbers<[1], [0], [0], [1], [0, 0, 1, 1], [], []>} : vector<16x128xbf16>, vector<128x32xbf16>, vector<16x32xf32> -> vector<16x32xf32>
    %9 = vector.extract_strided_slice %8 {offsets = [0, 0], sizes = [16, 8], strides = [1, 1]} : vector<16x32xf32> to vector<16x8xf32>
    %10 = vector.extract_strided_slice %9 {offsets = [0, 4], sizes = [16, 4], strides = [1, 1]} : vector<16x8xf32> to vector<16x4xf32>
    %11 = vector.extract_strided_slice %9 {offsets = [0, 0], sizes = [16, 4], strides = [1, 1]} : vector<16x8xf32> to vector<16x4xf32>
    %12 = tpu.concatenate %10, %11 in 1 : vector<16x4xf32>, vector<16x4xf32> -> vector<16x8xf32>
    %13 = arith.mulf %9, %2 : vector<16x8xf32>
    %14 = arith.mulf %12, %3 : vector<16x8xf32>
    %15 = arith.addf %13, %14 : vector<16x8xf32>
    %cst_10 = arith.constant 0.353553385 : f32
    %16 = vector.broadcast %cst_10 : f32 to vector<16x8xf32>
    %17 = arith.mulf %15, %16 : vector<16x8xf32>
    %18 = vector.extract_strided_slice %8 {offsets = [0, 8], sizes = [16, 8], strides = [1, 1]} : vector<16x32xf32> to vector<16x8xf32>
    %19 = vector.extract_strided_slice %18 {offsets = [0, 4], sizes = [16, 4], strides = [1, 1]} : vector<16x8xf32> to vector<16x4xf32>
    %20 = vector.extract_strided_slice %18 {offsets = [0, 0], sizes = [16, 4], strides = [1, 1]} : vector<16x8xf32> to vector<16x4xf32>
    %21 = tpu.concatenate %19, %20 in 1 : vector<16x4xf32>, vector<16x4xf32> -> vector<16x8xf32>
    %22 = arith.mulf %18, %2 : vector<16x8xf32>
    %23 = arith.mulf %21, %3 : vector<16x8xf32>
    %24 = arith.addf %22, %23 : vector<16x8xf32>
    %cst_11 = arith.constant 0.353553385 : f32
    %25 = vector.broadcast %cst_11 : f32 to vector<16x8xf32>
    %26 = arith.mulf %24, %25 : vector<16x8xf32>
    %27 = vector.extract_strided_slice %8 {offsets = [0, 16], sizes = [16, 8], strides = [1, 1]} : vector<16x32xf32> to vector<16x8xf32>
    %28 = vector.extract_strided_slice %27 {offsets = [0, 4], sizes = [16, 4], strides = [1, 1]} : vector<16x8xf32> to vector<16x4xf32>
    %29 = vector.extract_strided_slice %27 {offsets = [0, 0], sizes = [16, 4], strides = [1, 1]} : vector<16x8xf32> to vector<16x4xf32>
    %30 = tpu.concatenate %28, %29 in 1 : vector<16x4xf32>, vector<16x4xf32> -> vector<16x8xf32>
    %31 = arith.mulf %27, %2 : vector<16x8xf32>
    %32 = arith.mulf %30, %3 : vector<16x8xf32>
    %33 = arith.addf %31, %32 : vector<16x8xf32>
    %cst_12 = arith.constant 0.353553385 : f32
    %34 = vector.broadcast %cst_12 : f32 to vector<16x8xf32>
    %35 = arith.mulf %33, %34 : vector<16x8xf32>
    %36 = vector.extract_strided_slice %8 {offsets = [0, 24], sizes = [16, 8], strides = [1, 1]} : vector<16x32xf32> to vector<16x8xf32>
    %37 = vector.extract_strided_slice %36 {offsets = [0, 4], sizes = [16, 4], strides = [1, 1]} : vector<16x8xf32> to vector<16x4xf32>
    %38 = vector.extract_strided_slice %36 {offsets = [0, 0], sizes = [16, 4], strides = [1, 1]} : vector<16x8xf32> to vector<16x4xf32>
    %39 = tpu.concatenate %37, %38 in 1 : vector<16x4xf32>, vector<16x4xf32> -> vector<16x8xf32>
    %40 = arith.mulf %36, %2 : vector<16x8xf32>
    %41 = arith.mulf %39, %3 : vector<16x8xf32>
    %42 = arith.addf %40, %41 : vector<16x8xf32>
    %cst_13 = arith.constant 0.353553385 : f32
    %43 = vector.broadcast %cst_13 : f32 to vector<16x8xf32>
    %44 = arith.mulf %42, %43 : vector<16x8xf32>
    %45 = tpu.concatenate %17, %26, %35, %44 in 1 : vector<16x8xf32>, vector<16x8xf32>, vector<16x8xf32>, vector<16x8xf32> -> vector<16x32xf32>
    %c0_14 = arith.constant 0 : index
    %c0_15 = arith.constant 0 : index
    %46 = vector.load %arg10[%c0_14, %c0_15] : memref<16x32xf32, #tpu.memory_space<vmem>>, vector<16x32xf32>
    tpu.vector_store %arg10[%c0_14, %c0_15], %45 {strides = array<i32>} : memref<16x32xf32, #tpu.memory_space<vmem>>, vector<16x32xf32>,
    %c0_16 = arith.constant 0 : index
    %c0_17 = arith.constant 0 : index
    %47 = vector.load %arg6[%c0_16, %c0_17] : memref<32x128xbf16, #tpu.memory_space<vmem>>, vector<32x128xbf16>
    %cst_18 = arith.constant dense<0.000000e+00> : vector<16x128xf32>
    %48 = tpu.matmul %1, %47, %cst_18 {dimension_numbers = #tpu.dot_dimension_numbers<[1], [0], [0], [1], [0, 0, 1, 1], [], []>} : vector<16x32xbf16>, vector<32x128xbf16>, vector<16x128xf32> -> vector<16x128xf32>
    %49 = arith.truncf %48 : vector<16x128xf32> to vector<16x128xbf16>
    %c0_19 = arith.constant 0 : index
    %c0_20 = arith.constant 0 : index
    %50 = vector.load %arg7[%c0_19, %c0_20] : memref<128x16xbf16, #tpu.memory_space<vmem>>, vector<128x16xbf16>
    %cst_21 = arith.constant dense<0.000000e+00> : vector<16x16xf32>
    %51 = tpu.matmul %49, %50, %cst_21 {dimension_numbers = #tpu.dot_dimension_numbers<[1], [0], [0], [1], [0, 0, 1, 1], [], []>} : vector<16x128xbf16>, vector<128x16xbf16>, vector<16x16xf32> -> vector<16x16xf32>
    %52 = vector.extract_strided_slice %51 {offsets = [0, 0], sizes = [16, 8], strides = [1, 1]} : vector<16x16xf32> to vector<16x8xf32>
    %53 = vector.extract_strided_slice %52 {offsets = [0, 4], sizes = [16, 4], strides = [1, 1]} : vector<16x8xf32> to vector<16x4xf32>
    %54 = vector.extract_strided_slice %52 {offsets = [0, 0], sizes = [16, 4], strides = [1, 1]} : vector<16x8xf32> to vector<16x4xf32>
    %55 = tpu.concatenate %53, %54 in 1 : vector<16x4xf32>, vector<16x4xf32> -> vector<16x8xf32>
    %56 = arith.mulf %52, %2 : vector<16x8xf32>
    %57 = arith.mulf %55, %3 : vector<16x8xf32>
    %58 = arith.addf %56, %57 : vector<16x8xf32>
    %59 = vector.extract_strided_slice %51 {offsets = [0, 8], sizes = [16, 8], strides = [1, 1]} : vector<16x16xf32> to vector<16x8xf32>
    %60 = vector.extract_strided_slice %59 {offsets = [0, 4], sizes = [16, 4], strides = [1, 1]} : vector<16x8xf32> to vector<16x4xf32>
    %61 = vector.extract_strided_slice %59 {offsets = [0, 0], sizes = [16, 4], strides = [1, 1]} : vector<16x8xf32> to vector<16x4xf32>
    %62 = tpu.concatenate %60, %61 in 1 : vector<16x4xf32>, vector<16x4xf32> -> vector<16x8xf32>
    %63 = arith.mulf %59, %2 : vector<16x8xf32>
    %64 = arith.mulf %62, %3 : vector<16x8xf32>
    %65 = arith.addf %63, %64 : vector<16x8xf32>
    %66 = tpu.concatenate %58, %65 in 1 : vector<16x8xf32>, vector<16x8xf32> -> vector<16x16xf32>
    %c0_22 = arith.constant 0 : index
    %c0_23 = arith.constant 0 : index
    %67 = vector.load %arg11[%c0_22, %c0_23] : memref<16x16xf32, #tpu.memory_space<vmem>>, vector<16x16xf32>
    tpu.vector_store %arg11[%c0_22, %c0_23], %66 {strides = array<i32>} : memref<16x16xf32, #tpu.memory_space<vmem>>, vector<16x16xf32>,
    %c0_24 = arith.constant 0 : index
    %c0_25 = arith.constant 0 : index
    %68 = vector.load %arg8[%c0_24, %c0_25] : memref<32x128xbf16, #tpu.memory_space<vmem>>, vector<32x128xbf16>
    %cst_26 = arith.constant dense<0.000000e+00> : vector<16x128xf32>
    %69 = tpu.matmul %1, %68, %cst_26 {dimension_numbers = #tpu.dot_dimension_numbers<[1], [0], [0], [1], [0, 0, 1, 1], [], []>} : vector<16x32xbf16>, vector<32x128xbf16>, vector<16x128xf32> -> vector<16x128xf32>
    %70 = arith.truncf %69 : vector<16x128xf32> to vector<16x128xbf16>
    %c0_27 = arith.constant 0 : index
    %c0_28 = arith.constant 0 : index
    %71 = vector.load %arg9[%c0_27, %c0_28] : memref<128x16xbf16, #tpu.memory_space<vmem>>, vector<128x16xbf16>
    %cst_29 = arith.constant dense<0.000000e+00> : vector<16x16xf32>
    %72 = tpu.matmul %70, %71, %cst_29 {dimension_numbers = #tpu.dot_dimension_numbers<[1], [0], [0], [1], [0, 0, 1, 1], [], []>} : vector<16x128xbf16>, vector<128x16xbf16>, vector<16x16xf32> -> vector<16x16xf32>
    %c0_30 = arith.constant 0 : index
    %c0_31 = arith.constant 0 : index
    %73 = vector.load %arg12[%c0_30, %c0_31] : memref<16x16xf32, #tpu.memory_space<vmem>>, vector<16x16xf32>
    tpu.vector_store %arg12[%c0_30, %c0_31], %72 {strides = array<i32>} : memref<16x16xf32, #tpu.memory_space<vmem>>, vector<16x16xf32>,
    return
  }
  func.func @transform_0(%arg0: i32) -> (i32, i32) {
    %c0_i32 = arith.constant 0 : i32
    %c0_i32_0 = arith.constant 0 : i32
    return %arg0, %c0_i32 : i32, i32
  }
  func.func @transform_1(%arg0: i32) -> (i32, i32) {
    %c0_i32 = arith.constant 0 : i32
    %c0_i32_0 = arith.constant 0 : i32
    return %arg0, %c0_i32 : i32, i32
  }
  func.func @transform_2(%arg0: i32) -> (i32, i32) {
    %c0_i32 = arith.constant 0 : i32
    %c0_i32_0 = arith.constant 0 : i32
    return %arg0, %c0_i32 : i32, i32
  }
  func.func @transform_3(%arg0: i32) -> (i32, i32) {
    %c0_i32 = arith.constant 0 : i32
    %c0_i32_0 = arith.constant 0 : i32
    %c0_i32_1 = arith.constant 0 : i32
    return %c0_i32, %c0_i32_0 : i32, i32
  }
  func.func @transform_4(%arg0: i32) -> (i32, i32) {
    %c0_i32 = arith.constant 0 : i32
    %c0_i32_0 = arith.constant 0 : i32
    %c0_i32_1 = arith.constant 0 : i32
    return %c0_i32, %c0_i32_0 : i32, i32
  }
  func.func @transform_5(%arg0: i32) -> (i32, i32) {
    %c0_i32 = arith.constant 0 : i32
    %c0_i32_0 = arith.constant 0 : i32
    %c0_i32_1 = arith.constant 0 : i32
    return %c0_i32, %c0_i32_0 : i32, i32
  }
  func.func @transform_6(%arg0: i32) -> (i32, i32) {
    %c0_i32 = arith.constant 0 : i32
    %c0_i32_0 = arith.constant 0 : i32
    %c0_i32_1 = arith.constant 0 : i32
    return %c0_i32, %c0_i32_0 : i32, i32
  }
  func.func @transform_7(%arg0: i32) -> (i32, i32) {
    %c0_i32 = arith.constant 0 : i32
    %c0_i32_0 = arith.constant 0 : i32
    %c0_i32_1 = arith.constant 0 : i32
    return %c0_i32, %c0_i32_0 : i32, i32
  }
  func.func @transform_8(%arg0: i32) -> (i32, i32) {
    %c0_i32 = arith.constant 0 : i32
    %c0_i32_0 = arith.constant 0 : i32
    %c0_i32_1 = arith.constant 0 : i32
    return %c0_i32, %c0_i32_0 : i32, i32
  }
  func.func @transform_9(%arg0: i32) -> (i32, i32) {
    %c0_i32 = arith.constant 0 : i32
    %c0_i32_0 = arith.constant 0 : i32
    return %arg0, %c0_i32 : i32, i32
  }
  func.func @transform_10(%arg0: i32) -> (i32, i32) {
    %c0_i32 = arith.constant 0 : i32
    %c0_i32_0 = arith.constant 0 : i32
    return %arg0, %c0_i32 : i32, i32
  }
  func.func @transform_11(%arg0: i32) -> (i32, i32) {
    %c0_i32 = arith.constant 0 : i32
    %c0_i32_0 = arith.constant 0 : i32
    return %arg0, %c0_i32 : i32, i32
  }
}

</mosaic_0001>

<bundles_post_ra>
// kernel: tpu_custom_call.1
= control target key start
LH: loop header
LB: loop body
LE: loop exit
PB: predicated region body
PF: predicated region fallthrough
CT: control target
= control target key end

     0   :  { %17 = vsyncpa [#allocation3], 0  ;;  %v1030_v1 = vmov 0.0   ;;  %vm1031_vm0 = vmmov 0   ;;  %vm61_vm1 = vcmask 261120   ;;  %s1413_s0 = inlined_call_operand.vmem [shape: f32[16,32], index: 0, kind: input, shape index: {}]   ;;  %s1414_s1 = inlined_call_operand.vmem [shape: f32[16,8], index: 1, kind: input, shape index: {}]   ;;  %s1415_s2 = inlined_call_operand.vmem [shape: f32[16,8], index: 2, kind: input, shape index: {}]   ;;  %s1416_s3 = inlined_call_operand.vmem [shape: bf16[32,128], index: 3, kind: input, shape index: {}]   ;;  %s1417_s4 = inlined_call_operand.vmem [shape: bf16[128,32], index: 4, kind: input, shape index: {}]   ;;  %s1418_s5 = inlined_call_operand.vmem [shape: bf16[32,128], index: 5, kind: input, shape index: {}]   ;;  %s1419_s6 = inlined_call_operand.vmem [shape: bf16[128,16], index: 6, kind: input, shape index: {}]   ;;  %s1420_s7 = inlined_call_operand.vmem [shape: bf16[32,128], index: 7, kind: input, shape index: {}]   ;;  %s1421_s8 = inlined_call_operand.vmem [shape: bf16[128,16], index: 8, kind: input, shape index: {}]   ;;  %s1422_s9 = inlined_call_operand.hbm [shape: f32[16,32], index: 9, kind: output, shape index: {0}]   ;;  %s1423_s10 = inlined_call_operand.hbm [shape: f32[16,16], index: 10, kind: output, shape index: {1}]   ;;  %s1424_s11 = inlined_call_operand.hbm [shape: f32[16,16], index: 11, kind: output, shape index: {2}]  }
   0x1   :  { %v930_v0 = vld [vmem:[%s1416_s3] sm:$0xff]   ;;  %832 = vmatprep.subr.bf16.mxu0 %v1030_v1  ;;  %v931_v2 = vld [vmem:[%s1416_s3 + $0x8] sm:$0xff]   ;;  %840 = vmatprep.subr.bf16.mxu1 %v1030_v1  ;;  %v936_v10 = vld [vmem:[%s1417_s4 + $0x10] sm:$0xff]  }
   0x2   :  { %833 = vmatpush3.bf16.msra.mxu0 %v930_v0  ;;  %836 = vmatprep.mubr.msk.bf16.mxu0 %vm1031_vm0, %v1030_v1  ;;  %v38_v3 = vld [vmem:[%s1413_s0] sm:$0xff]  ;;  %v39_v4 = vld [vmem:[%s1413_s0 + $0x8] sm:$0xff]  ;;  %v937_v12 = vld [vmem:[%s1417_s4 + $0x18] sm:$0xff]  }
   0x3   :  { %834 = vmatprep.subr.bf16.mxu0 %v1030_v1  ;;  %856 = vmatprep.mubr.msk.bf16.mxu1 %vm1031_vm0, %v1030_v1  ;;  %v1123_v5 = vpack.c.bf16 %v39_v4, %v38_v3  ;;  %v934_v6 = vld [vmem:[%s1417_s4] sm:$0xff]   ;;  %v935_v8 = vld [vmem:[%s1417_s4 + $0x8] sm:$0xff]   ;;  %v942_v15 = vld [vmem:[%s1419_s6 + $0x10] sm:$0xff]  }
   0x4   :  { %v932_v7 = vld [vmem:[%s1418_s5] sm:$0xff]   ;;  %841 = vmatpush3.bf16.msra.mxu1 %v934_v6  ;;  %v933_v9 = vld [vmem:[%s1418_s5 + $0x8] sm:$0xff]  }
   0x5   :  { %842 = vmatprep.subr.bf16.mxu1 %v1030_v1  ;;  %v938_v11 = vld [vmem:[%s1419_s6] sm:$0xff]   ;;  %v940_v13 = vld [vmem:[%s1419_s6 + $0x8] sm:$0xff]  }
   0x6   :  { %835 = vmatpush3.bf16.msra.mxu0 %v931_v2  ;;  %v939_v14 = vld [vmem:[%s1417_s4 + $0x20] sm:$0xff]   ;;  %v941_v16 = vld [vmem:[%s1417_s4 + $0x28] sm:$0xff]  }
   0x7   :  { %860 = vmatprep.subr.bf16.mxu0 %v1030_v1 }
   0x8   :  { %843 = vmatpush3.bf16.msra.mxu1 %v935_v8 }
   0x9   :  { %837 = vmatmul.mubr.msk.bf16.vlgmr.msra.gmra.mrb[0].mxu0 %vm61_vm1, %v1123_v5  ;;  %844 = vmatprep.subr.bf16.mxu1 %v1030_v1 }
   0xa   :  { %861 = vmatpush3.bf16.msra.mxu0 %v932_v7  ;;  %864 = vmatprep.mubr.msk.bf16.mxu0 %vm1031_vm0, %v1030_v1 }
   0xb   :  { %862 = vmatprep.subr.bf16.mxu0 %v1030_v1 }
   0xc   :  { %845 = vmatpush3.bf16.msra.mxu1 %v936_v10 }
   0xd   :  { %846 = vmatprep.subr.bf16.mxu1 %v1030_v1 }
   0xe   :  { %863 = vmatpush3.bf16.msra.mxu0 %v933_v9 }
   0xf   :  { %868 = vmatprep.subr.bf16.mxu0 %v1030_v1 }
  0x10   :  { %847 = vmatpush3.bf16.msra.mxu1 %v937_v12 }
  0x11   :  { %865 = vmatmul.mubr.msk.bf16.vlgmr.msra.gmra.mrb[4].mxu0 %vm61_vm1, %v1123_v5  ;;  %848 = vmatprep.subr.bf16.mxu1 %v1030_v1 }
  0x12   :  { %869 = vmatpush3.bf16.msra.mxu0 %v938_v11  ;;  %884 = vmatprep.mubr.msk.bf16.mxu0 %vm1031_vm0, %v1030_v1 }
  0x13   :  { %870 = vmatprep.subr.bf16.mxu0 %v1030_v1 }
  0x14   :  { %849 = vmatpush3.bf16.msra.mxu1 %v939_v14 }
  0x15   :  { %850 = vmatprep.subr.bf16.mxu1 %v1030_v1 }
  0x16   :  { %871 = vmatpush3.bf16.msra.mxu0 %v940_v13 }
  0x17   :  { %872 = vmatprep.subr.bf16.mxu0 %v1030_v1 }
  0x18   :  { %18 = vsyncpa [#allocation5], 0  ;;  %v944_v17 = vld [vmem:[%s1419_s6 + $0x18] sm:$0xff]   ;;  %851 = vmatpush3.bf16.msra.mxu1 %v941_v16  ;;  %v943_v18 = vld [vmem:[%s1417_s4 + $0x30] sm:$0xff]   ;;  %s1032_s16 = smov 116   ;;  %s1033_s5 = smov 124  }
  0x19   :  { %852 = vmatprep.subr.bf16.mxu1 %v1030_v1  ;;  %v945_v19 = vld [vmem:[%s1417_s4 + $0x38] sm:$0xff]   ;;  %v946_v20 = vld [vmem:[%s1419_s6 + $0x20] sm:$0xff]   ;;  %v947_v21 = vld [vmem:[%s1419_s6 + $0x28] sm:$0xff]   ;;  %s1036_s17 = smov 4   ;;  %s1038_s18 = smov 16   ;;  %vm226_vm2 = vcmask 31744  }
  0x1a   :  { %873 = vmatpush3.bf16.msra.mxu0 %v942_v15  ;;  %v948_v22 = vld [vmem:[%s1419_s6 + $0x30] sm:$0xff]   ;;  %v949_v23 = vld [vmem:[%s1419_s6 + $0x38] sm:$0xff]   ;;  %v950_v32 = vld [vmem:[%s1420_s7] sm:$0xff]   ;;  %s1037_s6 = smov 8   ;;  %s1039_s19 = smov 24   ;;  %vm332_vm3 = vcmask 130048  }
  0x1b   :  { %874 = vmatprep.subr.bf16.mxu0 %v1030_v1  ;;  %v951_v35 = vld [vmem:[%s1420_s7 + $0x8] sm:$0xff]   ;;  %v952_v36 = vld [vmem:[%s1421_s8] sm:$0xff]   ;;  %v954_v38 = vld [vmem:[%s1421_s8 + $0x10] sm:$0xff]   ;;  %vm329_vm4 = vcmask 64512   ;;  %vm335_vm5 = vcmask 195584   ;;  %s1041_s24 = smov [#allocation4]  }
  0x1c   :  { %853 = vmatpush3.bf16.msra.mxu1 %v943_v18  ;;  %v953_v37 = vld [vmem:[%s1421_s8 + $0x8] sm:$0xff]   ;;  %v955_v39 = vld [vmem:[%s1421_s8 + $0x18] sm:$0xff]   ;;  %v956_v40 = vld [vmem:[%s1421_s8 + $0x20] sm:$0xff]   ;;  %s733_s3 = sshll.u32 %s1041_s24, 4  ;;  %s1042_s25 = smov [#allocation6]   ;;  %s1352_s3 = int_to_ptr.vmem [resolvable:$true] %s733_s3 }
  0x1d   :  { %854 = vmatprep.subr.bf16.mxu1 %v1030_v1  ;;  %v957_v41 = vld [vmem:[%s1421_s8 + $0x28] sm:$0xff]   ;;  %v958_v42 = vld [vmem:[%s1421_s8 + $0x30] sm:$0xff]   ;;  %v959_v43 = vld [vmem:[%s1421_s8 + $0x38] sm:$0xff]   ;;  %s1034_s8 = smov 108   ;;  %s745_s26 = sshll.u32 %s1042_s25, 4  ;;  %s1354_s26 = int_to_ptr.vmem [resolvable:$true] %s745_s26 }
  0x1e   :  { %875 = vmatpush3.bf16.msra.mxu0 %v944_v17  ;;  %v41_v44 = vld [vmem:[%s1414_s1] sm:$0xff]  ;;  %v42_v46 = vld [vmem:[%s1414_s1 + $0x8] sm:$0xff]  ;;  %s1035_s1 = smov 100  }
  0x1f   :  { %876 = vmatprep.subr.bf16.mxu0 %v1030_v1  ;;  %v43_v63 = vld [vmem:[%s1415_s2] sm:$0xff]  ;;  %v44_v14 = vld [vmem:[%s1415_s2 + $0x8] sm:$0xff]  ;;  %s1040_s2 = smov [#allocation2]  }
  0x20   :  { %855 = vmatpush3.bf16.msra.mxu1 %v945_v19  ;;  %s721_s23 = sshll.u32 %s1040_s2, 4  ;;  %s722_s23 = int_to_ptr.vmem [resolvable:$true] %s721_s23 }
  0x21   :  { %896 = vmatprep.subr.bf16.mxu1 %v1030_v1  ;;  %s960_s27 = scalar_lea.vmem %s722_s23, 256  ;;  %p965_p1 = scmp.lt.s32.totalorder %s722_s23, %s722_s23 }
  0x22   :  { %877 = vmatpush3.bf16.msra.mxu0 %v946_v20  ;;  %p961_p0 = scmp.ne.s32.totalorder %s722_s23, %s960_s27  ;;  %p966_p2 = scmp.lt.s32.totalorder %s960_s27, %s960_s27 }
  0x23   :  { %878 = vmatprep.subr.bf16.mxu0 %v1030_v1 }
  0x24   :  { %p967_p3 = por %p966_p2, %p965_p1 }
  0x26   :  { %879 = vmatpush3.bf16.msra.mxu0 %v947_v21  ;;  %p968_p4 = pnand %p967_p3, %p961_p0 }
  0x27   :  { %880 = vmatprep.subr.bf16.mxu0 %v1030_v1 }
  0x2a   :  { %881 = vmatpush3.bf16.msra.mxu0 %v948_v22 }
  0x2b   :  { %882 = vmatprep.subr.bf16.mxu0 %v1030_v1 }
  0x2e   :  { %883 = vmatpush3.bf16.msra.mxu0 %v949_v23 }
  0x2f   :  { %888 = vmatprep.subr.bf16.mxu0 %v1030_v1 }
  0xdc   :  { %v99_v24 = vpop.f32.mrb[0].mxu0 }
  0xdd   :  { %v838_v25 = vpop.f32.mrb[1].mxu0 }
  0xde   :  { %v102_v26 = vpop.f32.mrb[2].mxu0 }
  0xdf   :  { %v106_v27 = vpack.c.bf16 %v102_v26, %v99_v24  ;;  %v839_v28 = vpop.f32.mrb[3].mxu0 }
  0xe1   :  { %857 = vmatmul.mubr.bf16.vlgmr.msra.gmra.mrb[0].mxu1 %v106_v27 }
  0xe2   :  { %912 = vmatprep.mubr.msk.bf16.mxu1 %vm1031_vm0, %v1030_v1  ;;  %897 = vmatpush3.bf16.msra.mxu1 %v952_v36 }
  0xe3   :  { %898 = vmatprep.subr.bf16.mxu1 %v1030_v1 }
  0xe4   :  { %v390_v29 = vpop.f32.mrb[4].mxu0 }
  0xe5   :  { %v866_v30 = vpop.f32.mrb[5].mxu0 }
  0xe6   :  { %v393_v31 = vpop.f32.mrb[6].mxu0  ;;  %899 = vmatpush3.bf16.msra.mxu1 %v953_v37 }
  0xe7   :  { %v397_v33 = vpack.c.bf16 %v393_v31, %v390_v29  ;;  %v867_v34 = vpop.f32.mrb[7].mxu0  ;;  %900 = vmatprep.subr.bf16.mxu1 %v1030_v1 }
  0xe9   :  { %885 = vmatmul.mubr.bf16.vlgmr.msra.gmra.mrb[8].mxu0 %v397_v33 }
  0xea   :  { %889 = vmatpush3.bf16.msra.mxu0 %v950_v32  ;;  %892 = vmatprep.mubr.msk.bf16.mxu0 %vm1031_vm0, %v1030_v1 }
  0xeb   :  { %890 = vmatprep.subr.bf16.mxu0 %v1030_v1  ;;  %901 = vmatpush3.bf16.msra.mxu1 %v954_v38 }
  0xec   :  { %902 = vmatprep.subr.bf16.mxu1 %v1030_v1 }
  0xee   :  { %891 = vmatpush3.bf16.msra.mxu0 %v951_v35 }
  0xef   :  { %903 = vmatpush3.bf16.msra.mxu1 %v955_v39 }
  0xf0   :  { %904 = vmatprep.subr.bf16.mxu1 %v1030_v1 }
  0xf1   :  { %893 = vmatmul.mubr.msk.bf16.vlgmr.msra.gmra.mrb[12].mxu0 %vm61_vm1, %v1123_v5 }
  0xf3   :  { %905 = vmatpush3.bf16.msra.mxu1 %v956_v40 }
  0xf4   :  { %906 = vmatprep.subr.bf16.mxu1 %v1030_v1 }
  0xf7   :  { %907 = vmatpush3.bf16.msra.mxu1 %v957_v41 }
  0xf8   :  { %908 = vmatprep.subr.bf16.mxu1 %v1030_v1 }
  0xfb   :  { %909 = vmatpush3.bf16.msra.mxu1 %v958_v42 }
  0xfc   :  { %910 = vmatprep.subr.bf16.mxu1 %v1030_v1 }
  0xff   :  { %911 = vmatpush3.bf16.msra.mxu1 %v959_v43 }
 0x1b4   :  { %v1253_v45 = vpop.f32.mrb[0].mxu1 }
 0x1b5   :  { %237 = vrot.lane.b32.xlu1 %v1253_v45, %s1032_s16  ;;  %214 = vrot.lane.b32.xlu0 %v1253_v45, %s1033_s5  ;;  %v858_v47 = vpop.f32.mrb[1].mxu1  ;;  %v1262_v48 = vmul.f32 %v1253_v45, %v41_v44 }
 0x1b6   :  { %v1264_v49 = vpop.f32.mrb[2].mxu1 }
 0x1b7   :  { %v859_v50 = vpop.f32.mrb[3].mxu1  ;;  %v1267_v51 = vmul.f32 %v1264_v49, %v42_v46 }
 0x1b9   :  { %269 = vrot.lane.b32.xlu0 %v1253_v45, %s1034_s8  ;;  %239 = vrot.lane.b32.xlu1 %v1264_v49, %s1032_s16 }
 0x1bc   :  { %v1272_v52 = vpop.f32.mrb[8].mxu0 }
 0x1bd   :  { %299 = vrot.lane.b32.xlu0 %v1253_v45, %s1035_s1  ;;  %271 = vrot.lane.b32.xlu1 %v1264_v49, %s1034_s8  ;;  %v886_v53 = vpop.f32.mrb[9].mxu0  ;;  %v1277_v54 = vmul.f32 %v1272_v52, %v41_v44 }
 0x1be   :  { %v1279_v55 = vpop.f32.mrb[10].mxu0 }
 0x1bf   :  { %v887_v56 = vpop.f32.mrb[11].mxu0  ;;  %v1282_v57 = vmul.f32 %v1279_v55, %v42_v46 }
 0x1c1   :  { %301 = vrot.lane.b32.xlu1 %v1264_v49, %s1035_s1  ;;  %216 = vrot.lane.b32.xlu0 %v1264_v49, %s1033_s5 }
 0x1c4   :  { %v601_v58 = vpop.f32.mrb[12].mxu0 }
 0x1c5   :  { %505 = vrot.lane.b32.xlu0 %v1272_v52, %s1033_s5  ;;  %507 = vrot.lane.b32.xlu1 %v1279_v55, %s1033_s5  ;;  %v894_v59 = vpop.f32.mrb[13].mxu0 }
 0x1c6   :  { %v604_v60 = vpop.f32.mrb[14].mxu0 }
 0x1c7   :  { %v608_v61 = vpack.c.bf16 %v604_v60, %v601_v58  ;;  %v895_v62 = vpop.f32.mrb[15].mxu0 }
 0x1c9   :  { %525 = vrot.lane.b32.xlu0 %v1272_v52, %s1032_s16  ;;  %527 = vrot.lane.b32.xlu1 %v1279_v55, %s1032_s16 }
 0x1ca   :  { %913 = vmatmul.mubr.bf16.vlgmr.msra.gmra.mrb[4].mxu1 %v608_v61 }
 0x1cd   :  { %220 = vrot.lane.b32.xlu0 %v1253_v45, %s1036_s17  ;;  %222 = vrot.lane.b32.xlu1 %v1264_v49, %s1036_s17 }
 0x1d1   :  { %247 = vrot.lane.b32.xlu0 %v41_v44, %s1037_s6  ;;  %249 = vrot.lane.b32.xlu1 %v42_v46, %s1037_s6 }
 0x1d5   :  { %277 = vrot.lane.b32.xlu0 %v41_v44, %s1038_s18  ;;  %279 = vrot.lane.b32.xlu1 %v42_v46, %s1038_s18 }
 0x1d9   :  { %307 = vrot.lane.b32.xlu0 %v41_v44, %s1039_s19  ;;  %309 = vrot.lane.b32.xlu1 %v42_v46, %s1039_s19 }
 0x1dd   :  { %511 = vrot.lane.b32.xlu0 %v1272_v52, %s1036_s17  ;;  %513 = vrot.lane.b32.xlu1 %v1279_v55, %s1036_s17 }
 0x227   :  { %v238_v0 = vpop.permute.xlu1 %237  ;;  %v215_v1 = vpop.permute.xlu0 %214 }
 0x228   :  { %v243_v2 = vsel %vm226_vm2, %v238_v0, %v215_v1 }
 0x229   :  { %v255_v3 = vmul.f32 %v243_v2, %v43_v63 }
 0x22b   :  { %v270_v4 = vpop.permute.xlu0 %269  ;;  %v240_v5 = vpop.permute.xlu1 %239  ;;  %259 = vrot.lane.b32.xlu0 %v255_v3, %s1037_s6 }
 0x22c   :  { %v275_v6 = vsel %vm226_vm2, %v270_v4, %v238_v0 }
 0x22d   :  { %v285_v7 = vmul.f32 %v275_v6, %v43_v63 }
 0x22f   :  { %v300_v8 = vpop.permute.xlu0 %299  ;;  %v272_v9 = vpop.permute.xlu1 %271  ;;  %289 = vrot.lane.b32.xlu0 %v285_v7, %s1038_s18 }
 0x230   :  { %v305_v10 = vsel %vm226_vm2, %v300_v8, %v270_v4  ;;  %v276_v17 = vsel %vm226_vm2, %v272_v9, %v240_v5 }
 0x231   :  { %v315_v11 = vmul.f32 %v305_v10, %v43_v63  ;;  %v286_v20 = vmul.f32 %v276_v17, %v44_v14 }
 0x233   :  { %v302_v12 = vpop.permute.xlu1 %301  ;;  %v217_v13 = vpop.permute.xlu0 %216  ;;  %319 = vrot.lane.b32.xlu0 %v315_v11, %s1039_s19 }
 0x234   :  { %v244_v15 = vsel %vm226_vm2, %v240_v5, %v217_v13  ;;  %v306_v21 = vsel %vm226_vm2, %v302_v12, %v272_v9 }
 0x235   :  { %v256_v16 = vmul.f32 %v244_v15, %v44_v14  ;;  %v316_v25 = vmul.f32 %v306_v21, %v44_v14 }
 0x237   :  { %v506_v18 = vpop.permute.xlu0 %505  ;;  %261 = vrot.lane.b32.xlu1 %v256_v16, %s1037_s6  ;;  %v508_v19 = vpop.permute.xlu1 %507 }
 0x23b   :  { %v526_v22 = vpop.permute.xlu0 %525  ;;  %291 = vrot.lane.b32.xlu1 %v286_v20, %s1038_s18  ;;  %v528_v23 = vpop.permute.xlu1 %527 }
 0x23c   :  { %v531_v24 = vsel %vm226_vm2, %v526_v22, %v506_v18  ;;  %v532_v27 = vsel %vm226_vm2, %v528_v23, %v508_v19 }
 0x23d   :  { %v535_v26 = vmul.f32 %v531_v24, %v43_v63  ;;  %v536_v32 = vmul.f32 %v532_v27, %v44_v14 }
 0x23f   :  { %539 = vrot.lane.b32.xlu0 %v535_v26, %s1037_s6  ;;  %v221_v28 = vpop.permute.xlu0 %220  ;;  %321 = vrot.lane.b32.xlu1 %v316_v25, %s1039_s19  ;;  %v223_v29 = vpop.permute.xlu1 %222 }
 0x240   :  { %v227_v30 = vsel %vm226_vm2, %v215_v1, %v221_v28  ;;  %v228_v31 = vsel %vm226_vm2, %v217_v13, %v223_v29 }
 0x241   :  { %v231_v33 = vmul.f32 %v227_v30, %v43_v63  ;;  %v232_v34 = vmul.f32 %v228_v31, %v44_v14 }
 0x243   :  { %v233_v35 = vadd.f32 %v231_v33, %v1262_v48  ;;  %v234_v36 = vadd.f32 %v232_v34, %v1267_v51  ;;  %v248_v37 = vpop.permute.xlu0 %247  ;;  %541 = vrot.lane.b32.xlu1 %v536_v32, %s1037_s6  ;;  %v250_v38 = vpop.permute.xlu1 %249 }
 0x244   :  { %v253_v56 = vmul.f32 %v248_v37, %v1253_v45  ;;  %v254_v9 = vmul.f32 %v250_v38, %v1264_v49  ;;  %v534_v27 = vmul.f32 %v1279_v55, %v250_v38 }
 0x245   :  { %v235_v0 = vmul.f32 0.35355338, %v233_v35 }
 0x247   :  { %v278_v39 = vpop.permute.xlu0 %277  ;;  %v280_v40 = vpop.permute.xlu1 %279 }
 0x248   :  { %v283_v1 = vmul.f32 %v278_v39, %v1253_v45  ;;  %v284_v15 = vmul.f32 %v280_v40, %v1264_v49 }
 0x24b   :  { %v308_v41 = vpop.permute.xlu0 %307  ;;  %v310_v42 = vpop.permute.xlu1 %309 }
 0x24c   :  { %v313_v4 = vmul.f32 %v308_v41, %v1253_v45  ;;  %v314_v20 = vmul.f32 %v310_v42, %v1264_v49 }
 0x24f   :  { %v512_v43 = vpop.permute.xlu0 %511  ;;  %v514_v44 = vpop.permute.xlu1 %513 }
 0x250   :  { %v517_v46 = vsel %vm226_vm2, %v506_v18, %v512_v43  ;;  %v518_v47 = vsel %vm226_vm2, %v508_v19, %v514_v44  ;;  %v533_v19 = vmul.f32 %v1272_v52, %v248_v37 }
 0x251   :  { %v521_v50 = vmul.f32 %v517_v46, %v43_v63  ;;  %v522_v53 = vmul.f32 %v518_v47, %v44_v14  ;;  %v236_v14 = vmul.f32 0.35355338, %v234_v36 }
 0x253   :  { %v523_v48 = vadd.f32 %v521_v50, %v1277_v54  ;;  %v524_v51 = vadd.f32 %v522_v53, %v1282_v57 }
 0x29d   :  { %v260_v58 = vpop.permute.xlu0 %259  ;;  %v707_v59 = vpop.f32.mrb[4].mxu1 }
 0x29e   :  { %v265_v60 = vadd.f32 %v260_v58, %v253_v56  ;;  %714 = vst.msk [vmem:[#allocation6] sm:$0xff] %vm332_vm3, %v707_v59  ;;  %v914_v61 = vpop.f32.mrb[5].mxu1 }
 0x29f   :  { %v710_v62 = vpop.f32.mrb[6].mxu1 }
 0x2a0   :  { %v267_v63 = vmul.f32 0.35355338, %v265_v60  ;;  %715 = vst.msk [vmem:[#allocation6 + $0x8] sm:$0xff] %vm332_vm3, %v710_v62  ;;  %v915_v54 = vpop.f32.mrb[7].mxu1 }
 0x2a1   :  { %v290_v2 = vpop.permute.xlu0 %289 }
 0x2a2   :  { %v330_v57 = vsel %vm329_vm4, %v235_v0, %v267_v63  ;;  %v295_v3 = vadd.f32 %v290_v2, %v283_v1 }
 0x2a4   :  { %v297_v5 = vmul.f32 0.35355338, %v295_v3 }
 0x2a5   :  { %v320_v6 = vpop.permute.xlu0 %319 }
 0x2a6   :  { %v333_v7 = vsel %vm332_vm3, %v330_v57, %v297_v5  ;;  %v325_v8 = vadd.f32 %v320_v6, %v313_v4 }
 0x2a8   :  { %v327_v10 = vmul.f32 0.35355338, %v325_v8 }
 0x2a9   :  { %v262_v11 = vpop.permute.xlu1 %261 }
 0x2aa   :  { %v336_v12 = vsel %vm335_vm5, %v333_v7, %v327_v10  ;;  %v266_v13 = vadd.f32 %v262_v11, %v254_v9 }
 0x2ab   :  { %338 = vst.msk [vmem:[#allocation2] sm:$0xff] %vm61_vm1, %v336_v12 }
 0x2ac   :  { %v268_v16 = vmul.f32 0.35355338, %v266_v13 }
 0x2ad   :  { %v292_v45 = vpop.permute.xlu1 %291 }
 0x2ae   :  { %v331_v17 = vsel %vm329_vm4, %v236_v14, %v268_v16  ;;  %v296_v18 = vadd.f32 %v292_v45, %v284_v15 }
 0x2b0   :  { %v298_v21 = vmul.f32 0.35355338, %v296_v18 }
 0x2b1   :  { %v540_v22 = vpop.permute.xlu0 %539  ;;  %v322_v23 = vpop.permute.xlu1 %321 }
 0x2b2   :  { %v334_v24 = vsel %vm332_vm3, %v331_v17, %v298_v21  ;;  %v545_v25 = vadd.f32 %v540_v22, %v533_v19  ;;  %v326_v26 = vadd.f32 %v322_v23, %v314_v20 }
 0x2b4   :  { %v547_v28 = vsel %vm329_vm4, %v523_v48, %v545_v25  ;;  %v328_v29 = vmul.f32 0.35355338, %v326_v26 }
 0x2b5   :  { %549 = vst.msk [vmem:[#allocation4] sm:$0xff] %vm332_vm3, %v547_v28  ;;  %v542_v49 = vpop.permute.xlu1 %541 }
 0x2b6   :  { %v337_v52 = vsel %vm335_vm5, %v334_v24, %v328_v29  ;;  %v546_v30 = vadd.f32 %v542_v49, %v534_v27 }
 0x2b7   :  { %339 = vst.msk [vmem:[#allocation2 + $0x8] sm:$0xff] %vm61_vm1, %v337_v52 }
 0x2b8   :  { %v548_v55 = vsel %vm329_vm4, %v524_v51, %v546_v30 }
 0x2b9   :  { %971 = shalt.err (!%p968_p4)
}
 0x2ba   :  { %s972_s29 = scalar_lea.hbm %s1422_s9, 256 }
 0x2bb   :  { %p973_p5 = scmp.ne.s32.totalorder %s1422_s9, %s972_s29  ;;  %p976_p6 = scmp.lt.u32.totalorder %s972_s29, %s1422_s9 }
 0x2bd   :  { %p978_p7 = pnand %p976_p6, %p973_p5 }
 0x2bf   :  { %981 = shalt.err (!%p978_p7)
}
 0x2c0   :  { %s1043_s15 = smov 128   ;;  %550 = vst.msk [vmem:[#allocation4 + $0x8] sm:$0xff] %vm332_vm3, %v548_v55  ;;  %s982_s5 = scalar_lea.vmem %s1352_s3, 256 }
 0x2c1   :  { %727 = dma.vmem_to_hbm [thread:$0]  %s722_s23, 256, %s1422_s9, [#allocation3], %s1043_s15, %s1043_s15, %s1037_s6  }
 0x2c2   :  { %p983_p8 = scmp.ne.s32.totalorder %s1352_s3, %s982_s5  ;;  %p987_p9 = scmp.lt.s32.totalorder %s1352_s3, %s1352_s3 }
 0x2c3   :  { %p988_p10 = scmp.lt.s32.totalorder %s982_s5, %s982_s5 }
 0x2c5   :  { %p989_p11 = por %p988_p10, %p987_p9 }
 0x2c7   :  { %p990_p12 = pnand %p989_p11, %p983_p8 }
 0x2c9   :  { %993 = shalt.err (!%p990_p12)
}
 0x2ca   :  { %s994_s17 = scalar_lea.hbm %s1423_s10, 256 }
 0x2cb   :  { %p995_p13 = scmp.ne.s32.totalorder %s1423_s10, %s994_s17  ;;  %p998_p0 = scmp.lt.u32.totalorder %s994_s17, %s1423_s10 }
 0x2cd   :  { %p1000_p1 = pnand %p998_p0, %p995_p13 }
 0x2cf   :  { %1003 = shalt.err (!%p1000_p1)
}
 0x2d0   :  { %739 = dma.vmem_to_hbm [thread:$0]  %s1352_s3, 256, %s1423_s10, [#allocation5], %s1043_s15, %s1043_s15, %s1037_s6  }
 0x2d1   :  { %s1004_s7 = scalar_lea.vmem %s1354_s26, 256  ;;  %p1009_p3 = scmp.lt.s32.totalorder %s1354_s26, %s1354_s26 }
 0x2d2   :  { %p1005_p2 = scmp.ne.s32.totalorder %s1354_s26, %s1004_s7  ;;  %p1010_p4 = scmp.lt.s32.totalorder %s1004_s7, %s1004_s7 }
 0x2d4   :  { %p1011_p5 = por %p1010_p4, %p1009_p3 }
 0x2d6   :  { %p1012_p6 = pnand %p1011_p5, %p1005_p2 }
 0x2d8   :  { %1015 = shalt.err (!%p1012_p6)
}
 0x2d9   :  { %s1016_s24 = scalar_lea.hbm %s1424_s11, 256 }
 0x2da   :  { %p1017_p7 = scmp.ne.s32.totalorder %s1424_s11, %s1016_s24  ;;  %p1020_p8 = scmp.lt.u32.totalorder %s1016_s24, %s1424_s11 }
 0x2dc   :  { %p1022_p9 = pnand %p1020_p8, %p1017_p7 }
 0x2de   :  { %1025 = shalt.err (!%p1022_p9)
}
 0x2df   :  { %751 = dma.vmem_to_hbm [thread:$0]  %s1354_s26, 256, %s1424_s11, [#allocation5], %s1043_s15, %s1043_s15, %s1037_s6  }
 0x2e0   :  { %1026 = dma.done.wait [#allocation3], 256  }
 0x2e1   :  { %1027 = vsyncadd [#allocation3], 4294967040 }
 0x2e2   :  { %1028 = dma.done.wait [#allocation5], 512  }
 0x2e3   :  { %1029 = vsyncadd [#allocation5], 4294966784 }
 0x2e4   :  { %761 = vsyncpa [#allocation3], 1 }
 0x2e5   :  { %762 = vsyncpa [#allocation5], 1 }

</bundles_post_ra>
